<compile_context>
chip_gen: v7x
topology: tpu7x:2x2x1
jax: 0.10.0
libtpu: 0.0.40
codegen_flags: <defaults>
</compile_context>

<pallas_src>
import jax
import jax.numpy as jnp
from jax.experimental import pallas as pl
from jax.experimental.pallas import tpu as pltpu

_LANES = 128
_SUBLANES = 8


def _default_block_rows():
    # v7x-class chips (3.2 TB/s HBM) need ~4 MiB tiles to keep per-step
    # overhead <10%; v5e/v6e are happy at 2 MiB tiles.
    try:
        kind = jax.devices()[0].device_kind.lower()
    except Exception:
        return 4096
    if "7" in kind:
        return 8192
    return 4096


def _logreg_kernel(x_ref, w_ref, b_ref, o_ref):
    # x_ref: (block_rows, 128) VMEM tile; w_ref/b_ref: (1, 1) SMEM scalars.
    w = w_ref[0, 0]
    b = b_ref[0, 0]
    z = x_ref[...] * w + b                                # pure VPU multiply-add
    o_ref[...] = jax.nn.sigmoid(z).astype(o_ref.dtype)    # EUP exp/recip


def logistic_regression(x, w, b, *, max_block_rows=None):
    """sigmoid(x @ w.T + b) for Linear(1, 1).

    x: (N, 1) float32, w: (1, 1) float32, b: (1,) float32 -> (N, 1) float32
    """
    n = x.shape[0]
    dtype = jnp.float32

    if max_block_rows is None:
        max_block_rows = _default_block_rows()
    # Robustness: a caller-supplied cap that isn't a multiple of 8 would break
    # the (8,128) block-tiling constraint; round it down (min 8 sublanes).
    max_block_rows = max(_SUBLANES, (int(max_block_rows) // _SUBLANES) * _SUBLANES)

    # Lane-dense slab: flatten (N,1) -> (rows, 128). Only pad to the next lane
    # multiple; do NOT pad rows to a block multiple (ragged last block is
    # handled by Pallas boundary masking).
    rows = pl.cdiv(n, _LANES)
    x_flat = jnp.ravel(x).astype(dtype)
    if n % _LANES == 0:
        x_slab = x_flat.reshape(rows, _LANES)         # no HBM pad copy
    else:
        x_slab = jnp.pad(x_flat, (0, rows * _LANES - n)).reshape(rows, _LANES)

    if rows <= max_block_rows:
        block_rows = rows                             # single full-extent block
    else:
        block_rows = max_block_rows                   # multiple of 8 by construction

    grid = (pl.cdiv(rows, block_rows),)

    w2d = jnp.reshape(w, (1, 1)).astype(dtype)
    b2d = jnp.reshape(b, (1, 1)).astype(dtype)

    # Double-buffered in+out f32 ~= 4 * block_bytes; give ~50% headroom and
    # keep it within every generation's scoped-VMEM ceiling.
    block_bytes = block_rows * _LANES * 4
    vmem_limit = int(min(32 << 20, max(16 << 20, 6 * block_bytes)))

    out_slab = pl.pallas_call(
        _logreg_kernel,
        out_shape=jax.ShapeDtypeStruct((rows, _LANES), dtype),
        grid_spec=pl.GridSpec(
            grid=grid,
            in_specs=[
                pl.BlockSpec((block_rows, _LANES), lambda i: (i, 0)),  # x tile
                pl.BlockSpec(memory_space=pltpu.SMEM),                 # w scalar
                pl.BlockSpec(memory_space=pltpu.SMEM),                 # b scalar
            ],
            out_specs=pl.BlockSpec((block_rows, _LANES), lambda i: (i, 0)),
        ),
        compiler_params=pltpu.CompilerParams(
            dimension_semantics=("parallel",),
            vmem_limit_bytes=vmem_limit,
        ),
    )(x_slab, w2d, b2d)

    # Padded tail lanes hold sigmoid(b) / garbage from the ragged block; slice
    # them away before returning.
    out_flat = out_slab.reshape(-1)
    if n != rows * _LANES:
        out_flat = out_flat[:n]
    return out_flat.reshape(n, 1)


if __name__ == "__main__":
    key = jax.random.PRNGKey(0)
    kx, kw, kb = jax.random.split(key, 3)

    # Deterministic params mirroring nn.Linear(1, 1): W (1,1), b (1,).
    w = jax.random.uniform(kw, (1, 1), dtype=jnp.float32, minval=-1.0, maxval=1.0)
    b = jax.random.uniform(kb, (1,), dtype=jnp.float32, minval=-1.0, maxval=1.0)

    # 1) Small batch of scalar features (matches the module's toy usage).
    N = 8
    x = jax.random.normal(kx, (N, 1), dtype=jnp.float32)
    y = logistic_regression(x, w, b)
    jax.block_until_ready(y)
    y_ref = jax.nn.sigmoid(x @ w.T + b)
    assert y.shape == (N, 1)
    assert jnp.allclose(y, y_ref, atol=1e-6), (y, y_ref)

    # 2) N % 128 == 0 fast path (reshape-only, no pad copy), single block.
    N2 = 1024
    x2 = jax.random.normal(kx, (N2, 1), dtype=jnp.float32)
    y2 = logistic_regression(x2, w, b)
    jax.block_until_ready(y2)
    y2_ref = jax.nn.sigmoid(x2 @ w.T + b)
    assert y2.shape == (N2, 1)
    assert jnp.allclose(y2, y2_ref, atol=1e-6)

    # 3) Multi-block grid with a ragged last block, plus a non-multiple-of-8
    #    tile cap to exercise the rounding robustness (20 -> 16 rows).
    N3 = 2500
    x3 = jax.random.normal(kx, (N3, 1), dtype=jnp.float32)
    y3 = logistic_regression(x3, w, b, max_block_rows=20)
    jax.block_until_ready(y3)
    y3_ref = jax.nn.sigmoid(x3 @ w.T + b)
    assert y3.shape == (N3, 1)
    assert jnp.allclose(y3, y3_ref, atol=1e-6)

    print("KERNEL_OK")
</pallas_src>

<mosaic_0001>
module attributes {stable_mosaic.version = 11 : i64} {
  func.func @_logreg_kernel(%arg0: i32, %arg1: memref<1x128xf32, #tpu.memory_space<vmem>>, %arg2: memref<1x1xf32, #tpu.memory_space<smem>>, %arg3: memref<1x1xf32, #tpu.memory_space<smem>>, %arg4: memref<1x128xf32, #tpu.memory_space<vmem>>) attributes {dimension_semantics = [#tpu.dimension_semantics<parallel>], iteration_bounds = array<i64: 1>, scalar_prefetch = 0 : i64, scratch_operands = 0 : i64, tpu.core_type = #tpu.core_type<tc>, window_params = [{transform_indices = @transform_0, window_bounds = array<i64: 1, 128>}, {transform_indices = @transform_1, window_bounds = array<i64: 1, 1>}, {transform_indices = @transform_2, window_bounds = array<i64: 1, 1>}, {transform_indices = @transform_3, window_bounds = array<i64: 1, 128>}]} {
    %c0 = arith.constant 0 : index
    %c0_0 = arith.constant 0 : index
    %0 = memref.load %arg2[%c0, %c0_0] : memref<1x1xf32, #tpu.memory_space<smem>>
    %c0_1 = arith.constant 0 : index
    %c0_2 = arith.constant 0 : index
    %1 = memref.load %arg3[%c0_1, %c0_2] : memref<1x1xf32, #tpu.memory_space<smem>>
    %c0_3 = arith.constant 0 : index
    %c0_4 = arith.constant 0 : index
    %2 = vector.load %arg1[%c0_3, %c0_4] : memref<1x128xf32, #tpu.memory_space<vmem>>, vector<1x128xf32>
    %3 = vector.broadcast %0 : f32 to vector<1x128xf32>
    %4 = arith.mulf %2, %3 : vector<1x128xf32>
    %5 = vector.broadcast %1 : f32 to vector<1x128xf32>
    %6 = arith.addf %4, %5 : vector<1x128xf32>
    %7 = arith.negf %6 : vector<1x128xf32>
    %8 = math.exp %7 : vector<1x128xf32>
    %cst = arith.constant 1.000000e+00 : f32
    %9 = vector.broadcast %cst : f32 to vector<1x128xf32>
    %10 = arith.addf %9, %8 : vector<1x128xf32>
    %11 = arith.divf %9, %10 : vector<1x128xf32>
    %c0_5 = arith.constant 0 : index
    %c0_6 = arith.constant 0 : index
    %12 = vector.load %arg4[%c0_5, %c0_6] : memref<1x128xf32, #tpu.memory_space<vmem>>, vector<1x128xf32>
    tpu.vector_store %arg4[%c0_5, %c0_6], %11 {strides = array<i32>} : memref<1x128xf32, #tpu.memory_space<vmem>>, vector<1x128xf32>,
    return
  }
  func.func @transform_0(%arg0: i32) -> (i32, i32) {
    %c0_i32 = arith.constant 0 : i32
    %c0_i32_0 = arith.constant 0 : i32
    return %arg0, %c0_i32 : i32, i32
  }
  func.func @transform_1(%arg0: i32) -> (i32, i32) {
    %c0_i32 = arith.constant 0 : i32
    %c0_i32_0 = arith.constant 0 : i32
    %c0_i32_1 = arith.constant 0 : i32
    return %c0_i32, %c0_i32_0 : i32, i32
  }
  func.func @transform_2(%arg0: i32) -> (i32, i32) {
    %c0_i32 = arith.constant 0 : i32
    %c0_i32_0 = arith.constant 0 : i32
    %c0_i32_1 = arith.constant 0 : i32
    return %c0_i32, %c0_i32_0 : i32, i32
  }
  func.func @transform_3(%arg0: i32) -> (i32, i32) {
    %c0_i32 = arith.constant 0 : i32
    %c0_i32_0 = arith.constant 0 : i32
    return %arg0, %c0_i32 : i32, i32
  }
}

</mosaic_0001>

<bundles_post_ra>
// kernel: tpu_custom_call.1
= control target key start
LH: loop header
LB: loop body
LE: loop exit
PB: predicated region body
PF: predicated region fallthrough
CT: control target
= control target key end

     0   :  { %s117_s0 = inlined_call_operand.vmem [shape: f32[1,128], index: 0, kind: input, shape index: {}]   ;;  %s118_s1 = inlined_call_operand.<no memory space> [shape: f32[1,1], index: 1, kind: input, shape index: {}]   ;;  %s119_s2 = inlined_call_operand.<no memory space> [shape: f32[1,1], index: 2, kind: input, shape index: {}]   ;;  %s120_s3 = inlined_call_operand.hbm [shape: f32[1,128], index: 3, kind: output, shape index: {}]  }
   0x1   :  { %v19_v0 = vld [vmem:[%s117_s0] sm:$0x1]  ;;  %v20_v1 = vstv %s118_s1  ;;  %v22_v2 = vstv %s119_s2 }
   0x2   :  { %10 = vsyncpa [#allocation5], 0  ;;  %v21_v3 = vmul.f32 %v20_v1, %v19_v0  ;;  %s75_s18 = smov [#allocation4]  }
   0x3   :  { %s37_s19 = sshll.u32 %s75_s18, 4  ;;  %s38_s19 = int_to_ptr.vmem [resolvable:$true] %s37_s19 }
   0x4   :  { %v23_v4 = vadd.f32 %v22_v2, %v21_v3  ;;  %s51_s0 = scalar_lea.vmem %s38_s19, 16  ;;  %s55_s1 = scalar_lea.vmem %s38_s19, 32 }
   0x5   :  { %p52_p0 = scmp.ne.s32.totalorder %s38_s19, %s51_s0  ;;  %p56_p1 = scmp.lt.s32.totalorder %s38_s19, %s38_s19 }
   0x6   :  { %v45_v5 = vmul.f32 -1.442695, %v23_v4  ;;  %p57_p2 = scmp.lt.s32.totalorder %s55_s1, %s51_s0 }
   0x8   :  { %47 = vpow2.f32 %v45_v5  ;;  %p58_p3 = por %p57_p2, %p56_p1 }
   0xa   :  { %p59_p4 = pnand %p58_p3, %p52_p0 }
  0x12   :  { %v48_v6 = vpop.eup %47 }
  0x13   :  { %v27_v7 = vadd.f32 1.0, %v48_v6 }
  0x15   :  { %49 = vrcp.f32 %v27_v7 }
  0x1f   :  { %v50_v8 = vpop.eup %49 }
  0x20   :  { %30 = vst [vmem:[#allocation4] sm:$0x1] %v50_v8 }
  0x21   :  { %62 = shalt.err (!%p59_p4)
}
  0x22   :  { %s63_s21 = scalar_lea.hbm %s120_s3, 16 }
  0x23   :  { %p64_p5 = scmp.ne.s32.totalorder %s120_s3, %s63_s21  ;;  %p67_p6 = scmp.lt.u32.totalorder %s63_s21, %s120_s3 }
  0x25   :  { %p69_p7 = pnand %p67_p6, %p64_p5 }
  0x27   :  { %72 = shalt.err (!%p69_p7)
}
  0x28   :  { %40 = dma.vmem_to_hbm [thread:$0]  %s38_s19, 16, %s120_s3, [#allocation5]  }
  0x29   :  { %73 = dma.done.wait [#allocation5], 16  }
  0x2a   :  { %74 = vsyncadd [#allocation5], 4294967280 }
  0x2b   :  { %44 = vsyncpa [#allocation5], 1 }

</bundles_post_ra>
